<compile_context>
chip_gen: v7x
topology: tpu7x:2x2x1
jax: 0.10.0
libtpu: 0.0.40
codegen_flags: <defaults>
</compile_context>

<pallas_src>
import functools

import jax
import jax.numpy as jnp
import numpy as np
from jax import lax
from jax.experimental import pallas as pl
from jax.experimental.pallas import tpu as pltpu


def _round_up(x, m):
    return (x + m - 1) // m * m


def lr_kernel(idx_ref, conti_ref, tbl_ref, out_ref, *, dis_fea_num):
    """One lane-dense batch tile of LR.

    idx_ref   : (DIS, TB) int32   discrete indices, already offset into the flat table
    conti_ref : (C,   TB) float32 continuous feature rows
    tbl_ref   : (1,   T)  float32 concatenated 1-dim embedding tables (zero padded)
    out_ref   : (1,   TB) float32 sigmoid output (lane-dense)
    """
    idx = idx_ref[...]                   # (DIS, TB) int32
    tbl = tbl_ref[...]                   # (1, T)    float32
    t = tbl.shape[1]
    tb = idx.shape[1]

    # Continuous part: small sublane reduction over the C rows -> (1, TB).
    conti_sum = jnp.sum(conti_ref[...], axis=0, keepdims=True)

    # Discrete part: the per-field offsets partition the flat table, so fields
    # can never collide -> OR-accumulate a single bool multi-hot mask (one
    # compare per field, one convert at the end, no zero-init pass).
    sub_iota = lax.broadcasted_iota(jnp.int32, (t, tb), 0)       # (T, TB)
    mask = sub_iota == idx[0:1, :]
    for f in range(1, dis_fea_num):      # static unroll; DIS is small
        mask = mask | (sub_iota == idx[f:f + 1, :])

    # Contract the multi-hot mask against the table on the (otherwise idle)
    # MXU: (1, T) @ (T, TB) -> (1, TB).  Kept in f32 (exact); for large T on
    # v6e/v7x cast mask & table to bf16 to halve the MXU-feed traffic.
    emb_sum = jnp.dot(tbl, mask.astype(jnp.float32),
                      preferred_element_type=jnp.float32)

    z = emb_sum + conti_sum                                      # (1, TB)
    # sigmoid as a single EUP transcendental: sigmoid(z) = 0.5*tanh(z/2) + 0.5
    out_ref[...] = 0.5 * jnp.tanh(0.5 * z) + 0.5


def lr_forward(x, offsets, tbl_flat, dis_fea_num, tb=1024):
    """x: (B, feature_num); first dis_fea_num columns hold discrete indices
    (stored as float, exact for these small vocabularies).  Returns
    sigmoid(sum(per-field 1-dim embeddings) + sum(continuous features)) : (B, 1).

    offsets  : (DIS,) int32 per-field start positions inside the flat table
    tbl_flat : (1, T) float32 concatenated embedding tables (zero padded)

    NOTE: the fused gather materialises a (T, TB) mask per tile; fine for the
    small vocabularies LR uses.  For large T switch to per-field DMA gather.
    """
    b, f = x.shape
    dis = dis_fea_num
    c = f - dis

    # --- tile selection: lane-dense, always a multiple of 128; cap so there
    # are >= 2 grid steps on the 'parallel' axis whenever the batch allows it
    # (v7x shards those steps across its two TensorCores).
    b_pad128 = _round_up(b, 128)
    tb = max(128, (min(tb, b_pad128) // 128) * 128)
    if b_pad128 >= 256:
        tb = min(tb, max(128, ((b_pad128 // 2) // 128) * 128))
    b_pad = _round_up(b, tb)

    # --- split X once: int32 index rows (flat-table offsets pre-added) and
    # f32 continuous rows, batch on the lane axis.  Padded batch columns are
    # valid-but-meaningless and sliced off below.
    idx_t = x[:, :dis].astype(jnp.int32).T + offsets[:, None]     # (DIS, B)
    conti_t = x[:, dis:].T                                        # (C,   B)
    if b_pad != b:
        idx_t = jnp.pad(idx_t, ((0, 0), (0, b_pad - b)))
        conti_t = jnp.pad(conti_t, ((0, 0), (0, b_pad - b)))

    t = tbl_flat.shape[1]
    kernel = functools.partial(lr_kernel, dis_fea_num=dis)
    out = pl.pallas_call(
        kernel,
        out_shape=jax.ShapeDtypeStruct((1, b_pad), jnp.float32),
        grid=(b_pad // tb,),
        in_specs=[
            pl.BlockSpec((dis, tb), lambda i: (0, i)),   # index rows, lane-dense
            pl.BlockSpec((c, tb), lambda i: (0, i)),     # continuous rows
            pl.BlockSpec((1, t), lambda i: (0, 0)),      # flat table, resident
        ],
        out_specs=pl.BlockSpec((1, tb), lambda i: (0, i)),
        compiler_params=pltpu.CompilerParams(dimension_semantics=("parallel",)),
    )(idx_t, conti_t, tbl_flat)
    return out[0, :b][:, None]                            # (B, 1)


def xavier_uniform(key, shape):
    fan_in, fan_out = shape[0], shape[1]
    bound = float(np.sqrt(6.0 / (fan_in + fan_out)))
    return jax.random.uniform(key, shape, jnp.float32, minval=-bound, maxval=bound)


def ref_forward(x, tables, dis_fea_num):
    idx = x[:, :dis_fea_num].astype(jnp.int32)
    emb = sum(tables[i][idx[:, i], 0] for i in range(dis_fea_num))
    s = emb + jnp.sum(x[:, dis_fea_num:], axis=1)
    return jax.nn.sigmoid(s)[:, None]


if __name__ == "__main__":
    # module config (small, consistent with LR.__init__ / forward)
    dis_feafield_size = [5, 7, 11, 13]
    dis_fea_num = len(dis_feafield_size)          # 4 discrete fields
    feature_num = 8                               # 4 discrete + 4 continuous
    batch = 256                                   # -> 2 parallel grid steps of 128 lanes

    key = jax.random.PRNGKey(0)
    k_tbl, k_idx, k_conti = jax.random.split(key, 3)

    # deterministic xavier-uniform embedding tables, shape (fea_size, 1)
    tbl_keys = jax.random.split(k_tbl, dis_fea_num)
    tables = [xavier_uniform(tbl_keys[i], (dis_feafield_size[i], 1))
              for i in range(dis_fea_num)]

    # flatten + concat all tables into a (1, T) row; pad T to a multiple of 8
    tbl_concat = jnp.concatenate(tables, axis=0)            # (total, 1)
    total = tbl_concat.shape[0]
    t_pad = _round_up(total, 8)
    tbl_flat = jnp.zeros((1, t_pad), jnp.float32).at[0, :total].set(tbl_concat[:, 0])

    # per-field offsets into the flat table (pre-added to the indices in the wrapper)
    offsets = jnp.asarray(
        np.concatenate([[0], np.cumsum(dis_feafield_size[:-1])]), jnp.int32)   # (DIS,)

    # build X: discrete index columns (as float) then continuous columns
    # (indices are exact in float32 for these small vocab sizes)
    idx_keys = jax.random.split(k_idx, dis_fea_num)
    dis_cols = [
        jax.random.randint(idx_keys[i], (batch, 1), 0, dis_feafield_size[i]).astype(jnp.float32)
        for i in range(dis_fea_num)
    ]
    conti = jax.random.normal(k_conti, (batch, feature_num - dis_fea_num), jnp.float32)
    x = jnp.concatenate(dis_cols + [conti], axis=1)          # (B, feature_num)

    out = lr_forward(x, offsets, tbl_flat, dis_fea_num)
    out = jax.block_until_ready(out)

    expected = ref_forward(x, tables, dis_fea_num)
    np.testing.assert_allclose(np.asarray(out), np.asarray(expected), rtol=1e-4, atol=1e-4)
    print("KERNEL_OK")
</pallas_src>

<mosaic_0001>
module attributes {stable_mosaic.version = 11 : i64} {
  func.func @lr_kernel(%arg0: i32, %arg1: memref<4x128xi32, #tpu.memory_space<vmem>>, %arg2: memref<4x128xf32, #tpu.memory_space<vmem>>, %arg3: memref<1x40xf32, #tpu.memory_space<vmem>>, %arg4: memref<1x128xf32, #tpu.memory_space<vmem>>) attributes {dimension_semantics = [#tpu.dimension_semantics<parallel>], iteration_bounds = array<i64: 2>, scalar_prefetch = 0 : i64, scratch_operands = 0 : i64, tpu.core_type = #tpu.core_type<tc>, window_params = [{transform_indices = @transform_0, window_bounds = array<i64: 4, 128>}, {transform_indices = @transform_1, window_bounds = array<i64: 4, 128>}, {pipeline_mode = #tpu.pipeline_mode<synchronous>, transform_indices = @transform_2, window_bounds = array<i64: 1, 40>}, {transform_indices = @transform_3, window_bounds = array<i64: 1, 128>}]} {
    %c0 = arith.constant 0 : index
    %c0_0 = arith.constant 0 : index
    %0 = vector.load %arg1[%c0, %c0_0] : memref<4x128xi32, #tpu.memory_space<vmem>>, vector<4x128xi32>
    %c0_1 = arith.constant 0 : index
    %c0_2 = arith.constant 0 : index
    %1 = vector.load %arg3[%c0_1, %c0_2] : memref<1x40xf32, #tpu.memory_space<vmem>>, vector<1x40xf32>
    %c0_3 = arith.constant 0 : index
    %c0_4 = arith.constant 0 : index
    %2 = vector.load %arg2[%c0_3, %c0_4] : memref<4x128xf32, #tpu.memory_space<vmem>>, vector<4x128xf32>
    %cst = arith.constant dense<0.000000e+00> : vector<128xf32>
    %3 = vector.multi_reduction <add>, %2, %cst [0] : vector<4x128xf32> to vector<128xf32>
    %4 = vector.shape_cast %3 : vector<128xf32> to vector<1x128xf32>
    %5 = tpu.iota {dimensions = array<i32: 0>} : vector<40x128xi32>
    %6 = vector.extract_strided_slice %0 {offsets = [0, 0], sizes = [1, 128], strides = [1, 1]} : vector<4x128xi32> to vector<1x128xi32>
    %7 = vector.broadcast %6 : vector<1x128xi32> to vector<40x128xi32>
    %8 = arith.cmpi eq, %5, %7 : vector<40x128xi32>
    %9 = vector.extract_strided_slice %0 {offsets = [1, 0], sizes = [1, 128], strides = [1, 1]} : vector<4x128xi32> to vector<1x128xi32>
    %10 = vector.broadcast %9 : vector<1x128xi32> to vector<40x128xi32>
    %11 = arith.cmpi eq, %5, %10 : vector<40x128xi32>
    %12 = arith.ori %8, %11 : vector<40x128xi1>
    %13 = vector.extract_strided_slice %0 {offsets = [2, 0], sizes = [1, 128], strides = [1, 1]} : vector<4x128xi32> to vector<1x128xi32>
    %14 = vector.broadcast %13 : vector<1x128xi32> to vector<40x128xi32>
    %15 = arith.cmpi eq, %5, %14 : vector<40x128xi32>
    %16 = arith.ori %12, %15 : vector<40x128xi1>
    %17 = vector.extract_strided_slice %0 {offsets = [3, 0], sizes = [1, 128], strides = [1, 1]} : vector<4x128xi32> to vector<1x128xi32>
    %18 = vector.broadcast %17 : vector<1x128xi32> to vector<40x128xi32>
    %19 = arith.cmpi eq, %5, %18 : vector<40x128xi32>
    %20 = arith.ori %16, %19 : vector<40x128xi1>
    %21 = arith.extui %20 : vector<40x128xi1> to vector<40x128xi32>
    %22 = arith.sitofp %21 : vector<40x128xi32> to vector<40x128xf32>
    %cst_5 = arith.constant dense<0.000000e+00> : vector<1x128xf32>
    %23 = tpu.matmul %1, %22, %cst_5 {dimension_numbers = #tpu.dot_dimension_numbers<[1], [0], [0], [1], [0, 0, 1, 1], [], []>} : vector<1x40xf32>, vector<40x128xf32>, vector<1x128xf32> -> vector<1x128xf32>
    %24 = arith.addf %23, %4 : vector<1x128xf32>
    %cst_6 = arith.constant 5.000000e-01 : f32
    %25 = vector.broadcast %cst_6 : f32 to vector<1x128xf32>
    %26 = arith.mulf %25, %24 : vector<1x128xf32>
    %27 = math.tanh %26 : vector<1x128xf32>
    %cst_7 = arith.constant 5.000000e-01 : f32
    %28 = vector.broadcast %cst_7 : f32 to vector<1x128xf32>
    %29 = arith.mulf %28, %27 : vector<1x128xf32>
    %cst_8 = arith.constant 5.000000e-01 : f32
    %30 = vector.broadcast %cst_8 : f32 to vector<1x128xf32>
    %31 = arith.addf %29, %30 : vector<1x128xf32>
    %c0_9 = arith.constant 0 : index
    %c0_10 = arith.constant 0 : index
    %32 = vector.load %arg4[%c0_9, %c0_10] : memref<1x128xf32, #tpu.memory_space<vmem>>, vector<1x128xf32>
    tpu.vector_store %arg4[%c0_9, %c0_10], %31 {strides = array<i32>} : memref<1x128xf32, #tpu.memory_space<vmem>>, vector<1x128xf32>,
    return
  }
  func.func @transform_0(%arg0: i32) -> (i32, i32) {
    %c0_i32 = arith.constant 0 : i32
    %c0_i32_0 = arith.constant 0 : i32
    return %c0_i32, %arg0 : i32, i32
  }
  func.func @transform_1(%arg0: i32) -> (i32, i32) {
    %c0_i32 = arith.constant 0 : i32
    %c0_i32_0 = arith.constant 0 : i32
    return %c0_i32, %arg0 : i32, i32
  }
  func.func @transform_2(%arg0: i32) -> (i32, i32) {
    %c0_i32 = arith.constant 0 : i32
    %c0_i32_0 = arith.constant 0 : i32
    %c0_i32_1 = arith.constant 0 : i32
    return %c0_i32, %c0_i32_0 : i32, i32
  }
  func.func @transform_3(%arg0: i32) -> (i32, i32) {
    %c0_i32 = arith.constant 0 : i32
    %c0_i32_0 = arith.constant 0 : i32
    return %c0_i32, %arg0 : i32, i32
  }
}

</mosaic_0001>

<bundles_post_ra>
// kernel: tpu_custom_call.1
= control target key start
LH: loop header
LB: loop body
LE: loop exit
PB: predicated region body
PF: predicated region fallthrough
CT: control target
= control target key end

     0   :  { %8 = vsyncpa [#allocation3], 0  ;;  %s964_s0 = inlined_call_operand.hbm [shape: s32[4,256], index: 0, kind: input, shape index: {}]   ;;  %s965_s1 = inlined_call_operand.hbm [shape: f32[4,256], index: 1, kind: input, shape index: {}]   ;;  %s966_s2 = inlined_call_operand.vmem [shape: f32[1,40], index: 2, kind: input, shape index: {}]   ;;  %s967_s3 = inlined_call_operand.hbm [shape: f32[1,256], index: 3, kind: output, shape index: {}]  }
   0x1   :  { %10 = vsyncpa [#allocation3 + $0x1], 0 }
   0x2   :  { %11 = vsyncpa [#allocation6], 0 }
   0x3   :  { %13 = vsyncpa [#allocation6 + $0x1], 0 }
   0x4   :  { %14 = vsyncpa [#allocation4], 0 }
   0x5   :  { %16 = vsyncpa [#allocation4 + $0x1], 0  ;;  %s748_s12 = smov 0   ;;  %s750_s13 = smov 0  }
   0x6   :  { %s752_s14 = smov 0   ;;  %s754_s15 = smov 0  }
   0x7 LB: > { %s769_s16 = sadd.s32 4294967295, %s718_s15   ;;  %s481_s17 = sadd.s32 4294967294, %s718_s15   ;;  %s718_s15 = sphi %s754_s15, %s986_s15   ;;  %s714_s14 = sphi %s752_s14, %s985_s14   ;;  %s710_s13 = sphi %s750_s13, %s984_s13   ;;  %s706_s12 = sphi %s748_s12, %s983_s12  }
   0x8   : > { %s773_s18 = sadd.s32 1, %s718_s15   ;;  %s29_s19 = sadd.s32 1, %s714_s14 }
   0x9   : > { %s26_s20 = ssub.s32 %s718_s15, %s773_s18  ;;  %p36_p0 = scmp.ne.s32.totalorder %s714_s14, %s710_s13 }
   0xa   : > { %p27_p1 = scmp.eq.s32.totalorder %s26_s20, 0  ;;  %p37_p2 = scmp.eq.s32.totalorder %s718_s15, 0 }
   0xb   : > { %p42_p3 = scmp.ne.s32.totalorder %s710_s13, %s706_s12  ;;  %p43_p4 = scmp.eq.s32.totalorder %s769_s16, 0 }
   0xc   : > { %s785_s21 = scalar_select %p27_p1, %s714_s14, %s29_s19  }
   0xd   : > { %p787_p5 = por %p37_p2, %p36_p0  ;;  %p791_p6 = por %p43_p4, %p42_p3 }
   0xe   : > { %p113_p7 = scmp.eq.s32.totalorder %s769_s16, 1  ;;  %p119_p8 = scmp.eq.s32.totalorder %s481_s17, 1 }
   0xf   : > { %s971_s23 = scalar_select %p791_p6, 1, 0 }
  0x10   : > { %p547_p10 = scmp.lt.s32.totalorder %s718_s15, 2  ;;  %p798_p11 = por %p113_p7, %p36_p0 }
  0x11   : > { %p802_p12 = por %p119_p8, %p42_p3  ;;  %s807_s26 = sand.u32 1, %s714_s14  }
  0x12   : > { %s972_s24 = scalar_select %p798_p11, 1, 0 }
  0x13   : > { %s973_s25 = scalar_select %p802_p12, 1, 0 }
  0x14   : > { %s485_s27 = sshll.u32 %s718_s15, 6  ;;  %s484_s28 = sshll.u32 %s807_s26, 2 }
  0x15   : > { %s816_s4 = scalar_lea.hbm %s964_s0, %s485_s27  ;;  %s146_s5 = scalar_lea.vmem [#allocation2], %s484_s28 }
  0x16   : > { %s153_s6 = sshll.u32 %s146_s5, 4  ;;  %p822_p13 = pnand %p547_p10, %p787_p5  ;;  %s826_s6 = int_to_ptr.vmem [resolvable:$true] %s153_s6 }
  0x17   : > { %s143_s8 = scalar_lea.sflag [#allocation3], %s807_s26  ;;  %s588_s9 = scalar_lea.hbm %s816_s4, 64 }
  0x18   : > { %p589_p2 = scmp.ne.s32.totalorder %s816_s4, %s588_s9  ;;  %p590_p3 = pneg %p822_p13 }
  0x19   : > { %s593_s17 = scalar_lea.hbm %s964_s0, 128  ;;  %p594_p5 = scmp.lt.u32.totalorder %s816_s4, %s964_s0 }
  0x1a   : > { %p591_p4 = pnand %p590_p3, %p589_p2  ;;  %p595_p8 = scmp.lt.u32.totalorder %s593_s17, %s588_s9 }
  0x1b   : > { %p597_p9 = scmp.lt.u32.totalorder %s588_s9, %s816_s4 }
  0x1c   : > { %p592_p7 = pneg %p591_p4  ;;  %p596_p10 = por %p595_p8, %p594_p5 }
  0x1e   : > { %p598_p0 = por %p597_p9, %p596_p10 }
  0x20   : > { %p599_p1 = pnand %p598_p0, %p592_p7 }
  0x22   : > { %602 = shalt.err (!%p599_p1)
}
  0x23   : > { %s603_s22 = scalar_lea.vmem %s826_s6, 64  ;;  %s720_s29 = smov [#allocation2]  }
  0x24   : > { %p604_p2 = scmp.ne.s32.totalorder %s826_s6, %s603_s22  ;;  %s608_s30 = sshll.u32 %s720_s29, 4  ;;  %s609_s30 = int_to_ptr.vmem [resolvable:$false] %s608_s30 }
  0x25   : > { %s610_s5 = scalar_lea.vmem %s609_s30, 128  ;;  %p611_p11 = scmp.lt.s32.totalorder %s826_s6, %s609_s30 }
  0x26   : > { %p606_p4 = pnand %p604_p2, %p590_p3  ;;  %p612_p5 = scmp.lt.s32.totalorder %s610_s5, %s603_s22 }
  0x28   : > { %p607_p12 = pneg %p606_p4  ;;  %p613_p8 = por %p612_p5, %p611_p11 }
  0x2a   : > { %p614_p9 = pnand %p613_p8, %p607_p12 }
  0x2c   : > { %617 = shalt.err (!%p614_p9)
}
  0x2d   : > { %539 = dma.hbm_to_vmem [thread:$0]  (!%p822_p13), %s816_s4, 64, %s826_s6, %s143_s8  }
  0x2e   : > { %p975_p0 = scmp.lt.s32.totalorder %s718_s15, 3  ;;  %p976_p1 = scmp.ge.s32.totalorder %s718_s15, 1 }
  0x2f   : > { %s869_s17 = scalar_lea.hbm %s965_s1, %s485_s27  ;;  %s164_s19 = scalar_lea.vmem [#allocation5], %s484_s28 }
  0x30   : > { %p860_p7 = pnand %p976_p1, %p975_p0  ;;  %s171_s20 = sshll.u32 %s164_s19, 4  ;;  %s172_s20 = int_to_ptr.vmem [resolvable:$true] %s171_s20 }
  0x31   : > { %s161_s4 = scalar_lea.sflag [#allocation6], %s807_s26  ;;  %s618_s6 = scalar_lea.hbm %s869_s17, 64 }
  0x32   : > { %s977_s9 = scalar_select %p860_p7, 1, 0 }
  0x33   : > { %p619_p11 = scmp.ne.s32.totalorder %s869_s17, %s618_s6  ;;  %s623_s27 = scalar_lea.hbm %s965_s1, 128 }
  0x34   : > { %p624_p2 = scmp.lt.u32.totalorder %s869_s17, %s965_s1  ;;  %p625_p4 = scmp.lt.u32.totalorder %s623_s27, %s618_s6 }
  0x35   : > { %p621_p12 = pnand %p619_p11, %p590_p3  ;;  %p627_p8 = scmp.lt.u32.totalorder %s618_s6, %s869_s17 }
  0x36   : > { %p626_p5 = por %p625_p4, %p624_p2 }
  0x37   : > { %p622_p10 = pneg %p621_p12 }
  0x38   : > { %p628_p9 = por %p627_p8, %p626_p5 }
  0x3a   : > { %p629_p0 = pnand %p628_p9, %p622_p10 }
  0x3c   : > { %632 = shalt.err (!%p629_p0)
}
  0x3d   : > { %s633_s26 = scalar_lea.vmem %s172_s20, 64  ;;  %s721_s28 = smov [#allocation5]  }
  0x3e   : > { %p634_p1 = scmp.ne.s32.totalorder %s172_s20, %s633_s26  ;;  %s638_s5 = sshll.u32 %s721_s28, 4  ;;  %s639_s5 = int_to_ptr.vmem [resolvable:$false] %s638_s5 }
  0x3f   : > { %s640_s10 = scalar_lea.vmem %s639_s5, 128  ;;  %p641_p6 = scmp.lt.s32.totalorder %s172_s20, %s639_s5 }
  0x40   : > { %p636_p11 = pnand %p634_p1, %p590_p3  ;;  %p642_p7 = scmp.lt.s32.totalorder %s640_s10, %s633_s26 }
  0x42   : > { %p637_p12 = pneg %p636_p11  ;;  %p643_p2 = por %p642_p7, %p641_p6 }
  0x44   : > { %p644_p4 = pnand %p643_p2, %p637_p12 }
  0x46   : > { %647 = shalt.err (!%p644_p4)
}
  0x47   : > { %542 = dma.hbm_to_vmem [thread:$0]  (!%p822_p13), %s869_s17, 64, %s172_s20, %s161_s4  }
  0x48   : > { %p978_p10 = scmp.ne.s32.totalorder %s977_s9, 0 }
  0x49   : > { %s896_s11 = sand.u32 (!%p978_p10), 1, %s710_s13   ;;  %p979_p3 = scmp.ne.s32.totalorder (!%p978_p10), %s971_s23, 0 }
  0x4a   : > { %180 = sbr.rel (%p978_p10) target bundleno = 357 (0x165), region = 32  ;;  %s489_s19 = sshll.u32 (!%p978_p10), %s896_s11, 2 }
  0x4b   : > { %s183_s6 = scalar_lea.sflag (!%p978_p10), [#allocation3], %s896_s11  ;;  %s186_s8 = scalar_lea.vmem (!%p978_p10), [#allocation2], %s489_s19 }
  0x51   : > { %693 = dma.done.wait (%p979_p3), %s183_s6, 64  }
  0x52   : > { %695 = vsyncadd (%p979_p3), %s183_s6, 4294967232  ;;  %s192_s7 = scalar_lea.sflag [#allocation6], %s896_s11  ;;  %s905_s17 = scalar_lea.vmem [#allocation5], %s489_s19 }
  0x53   : > { %697 = dma.done.wait (%p979_p3), %s192_s7, 64  }
  0x54   : > { %699 = vsyncadd (%p979_p3), %s192_s7, 4294967232  ;;  %v233_v0 = vlaneseq  ;;  %v722_v1 = vmov 0.0|0.0   ;;  %vm723_vm0 = vmmov 0   ;;  %v724_v3 = vmov 0.0   ;;  %v222_v9 = vld [vmem:[%s186_s8] sm:$0xf] }
  0x55   : > { %524 = vmatprep.subr.bf16.mxu0 %v722_v1  ;;  %521 = vmatprep.mubr.msk.f32.mxu0 %vm723_vm0, %v724_v3  ;;  %v725_v16 = vmov 1.0|1.0   ;;  %v223_v18 = vld [vmem:[%s966_s2] sm:$0x1]  ;;  %v726_v19 = vmov 1.0   ;;  %s502_s20 = sshll.u32 %s769_s16, 4 }
  0x56   : > { %v234_v2 = vshrl.u32 %v233_v0, 7  ;;  %v224_v20 = vld [vmem:[%s905_s17] sm:$0xf]  ;;  %s221_s4 = scalar_lea.vmem [#allocation7], %s896_s11  ;;  %s920_s30 = scalar_lea.hbm %s967_s3, %s502_s20 }
  0x57   : > { %s392_s22 = sshll.u32 %s221_s4, 4  ;;  %s380_s26 = scalar_lea.sflag [#allocation4], %s896_s11  ;;  %s922_s22 = int_to_ptr.vmem [resolvable:$true] %s392_s22 }
  0x58   : > { %v241_v4 = vsub.s32 0, %v234_v2  ;;  %v250_v5 = vsub.s32 1, %v234_v2  ;;  %v264_v6 = vsub.s32 2, %v234_v2  ;;  %v278_v7 = vsub.s32 3, %v234_v2  ;;  %s648_s28 = scalar_lea.vmem %s922_s22, 16  ;;  %p980_p13 = scmp.ne.s32.totalorder %s972_s24, 0 }
  0x59   : > { %v235_v8 = vadd.s32 8, %v234_v2  ;;  %v236_v14 = vadd.s32 16, %v234_v2  ;;  %v237_v15 = vadd.s32 24, %v234_v2  ;;  %v238_v17 = vadd.s32 32, %v234_v2  ;;  %p649_p6 = scmp.ne.s32.totalorder %s922_s22, %s648_s28  ;;  %s727_s16 = smov [#allocation7]  }
  0x5a   : > { %v242_v10 = vrot.slane %v222_v9, %v241_v4  ;;  %v251_v11 = vrot.slane %v222_v9, %v250_v5  ;;  %v265_v12 = vrot.slane %v222_v9, %v264_v6  ;;  %v279_v13 = vrot.slane %v222_v9, %v278_v7  ;;  %s652_s5 = sshll.u32 %s727_s16, 4  ;;  %s653_s5 = int_to_ptr.vmem [resolvable:$false] %s652_s5 }
  0x5b   : > { %p650_p7 = pnand %p649_p6, %p980_p13  ;;  %s654_s10 = scalar_lea.vmem %s653_s5, 32 }
  0x5c   : > { %vm243_vm1 = vcmp.eq.s32.totalorder %v234_v2, %v242_v10  ;;  %vm244_vm2 = vcmp.eq.s32.totalorder %v235_v8, %v242_v10  ;;  %vm252_vm3 = vcmp.eq.s32.totalorder %v234_v2, %v251_v11  ;;  %vm253_vm4 = vcmp.eq.s32.totalorder %v235_v8, %v251_v11  ;;  %p655_p8 = scmp.lt.s32.totalorder %s922_s22, %s653_s5  ;;  %p656_p9 = scmp.lt.s32.totalorder %s654_s10, %s648_s28 }
  0x5d   : > { %vm257_vm5 = vmor %vm243_vm1, %vm252_vm3  ;;  %vm266_vm6 = vcmp.eq.s32.totalorder %v234_v2, %v265_v12  ;;  %vm267_vm7 = vcmp.eq.s32.totalorder %v235_v8, %v265_v12  ;;  %vm280_vm9 = vcmp.eq.s32.totalorder %v234_v2, %v279_v13  ;;  %vm281_vm11 = vcmp.eq.s32.totalorder %v235_v8, %v279_v13  ;;  %p651_p5 = pneg %p650_p7 }
  0x5e   : > { %vm258_vm8 = vmor %vm244_vm2, %vm253_vm4  ;;  %vm245_vm14 = vcmp.eq.s32.totalorder %v236_v14, %v242_v10  ;;  %vm254_vm15 = vcmp.eq.s32.totalorder %v236_v14, %v251_v11  ;;  %vm246_vm1 = vcmp.eq.s32.totalorder %v237_v15, %v242_v10  ;;  %vm255_vm3 = vcmp.eq.s32.totalorder %v237_v15, %v251_v11  ;;  %p657_p0 = por %p656_p9, %p655_p8 }
  0x5f   : > { %vm271_vm10 = vmor %vm257_vm5, %vm266_vm6  ;;  %vm268_vm4 = vcmp.eq.s32.totalorder %v236_v14, %v265_v12  ;;  %vm269_vm6 = vcmp.eq.s32.totalorder %v237_v15, %v265_v12 }
  0x60   : > { %vm272_vm12 = vmor %vm258_vm8, %vm267_vm7  ;;  %vm282_vm8 = vcmp.eq.s32.totalorder %v236_v14, %v279_v13  ;;  %p658_p1 = pnand %p657_p0, %p651_p5 }
  0x61   : > { %vm285_vm13 = vmor %vm271_vm10, %vm280_vm9  ;;  %vm283_vm10 = vcmp.eq.s32.totalorder %v237_v15, %v279_v13 }
  0x62   : > { %vm286_vm0 = vmor %vm272_vm12, %vm281_vm11 }
  0x63   : > { %vm525_vm2 = vmpackc.low %vm286_vm0, %vm285_vm13  ;;  %vm247_vm0 = vcmp.eq.s32.totalorder %v238_v17, %v242_v10  ;;  %vm256_vm13 = vcmp.eq.s32.totalorder %v238_v17, %v251_v11 }
  0x64   : > { %526 = vmatpush3.bf16.msk.msra.mxu0 %vm525_vm2, %v725_v16  ;;  %vm259_vm5 = vmor %vm245_vm14, %vm254_vm15  ;;  %vm270_vm14 = vcmp.eq.s32.totalorder %v238_v17, %v265_v12 }
  0x65   : > { %527 = vmatprep.subr.bf16.mxu0 %v722_v1  ;;  %vm260_vm7 = vmor %vm246_vm1, %vm255_vm3  ;;  %vm284_vm1 = vcmp.eq.s32.totalorder %v238_v17, %v279_v13 }
  0x66   : > { %vm273_vm9 = vmor %vm259_vm5, %vm268_vm4 }
  0x67   : > { %vm274_vm11 = vmor %vm260_vm7, %vm269_vm6  ;;  %vm300_vm6 = vcmask 326656   ;;  %vm225_vm7 = vcmask 1043456  }
  0x68   : > { %vm287_vm12 = vmor %vm273_vm9, %vm282_vm8  ;;  %v226_v21 = vsel %vm225_vm7, %v224_v20, 0.0 }
  0x69   : > { %vm288_vm2 = vmor %vm274_vm11, %vm283_vm10  ;;  %v227_v22 = vrot.slane %v226_v21, 4 }
  0x6a   : > { %vm528_vm15 = vmpackc.low %vm288_vm2, %vm287_vm12 }
  0x6b   : > { %529 = vmatpush3.bf16.msk.msra.mxu0 %vm528_vm15, %v725_v16  ;;  %vm261_vm3 = vmor %vm247_vm0, %vm256_vm13  ;;  %v228_v23 = vadd.f32 %v227_v22, %v226_v21 }
  0x6c   : > { %519 = vmatprep.subr.mxu0 %v724_v3  ;;  %vm275_vm4 = vmor %vm261_vm3, %vm270_vm14 }
  0x6d   : > { %vm289_vm5 = vmor %vm275_vm4, %vm284_vm1  ;;  %v229_v24 = vrot.slane %v228_v23, 2 }
  0x6f   : > { %520 = vmatpush3.msk.msra.mxu0 %vm289_vm5, %v726_v19  ;;  %v230_v25 = vadd.f32 %v229_v24, %v228_v23 }
  0x70   : > { %522 = vmatmul.mubr.msk.f32.vlgmr.msra.gmra.mrb[0].mxu0 %vm300_vm6, %v223_v18 }
  0x71   : > { %v231_v26 = vrot.slane %v230_v25, 1 }
  0x73   : > { %v232_v27 = vadd.f32 %v231_v26, %v230_v25 }
 0x143   : > { %v370_v28 = vpop.f32.mrb[0].mxu0 }
 0x144   : > { %v371_v29 = vadd.f32 %v370_v28, %v232_v27  ;;  %v523_v30 = vpop.f32.mrb[1].mxu0 }
 0x146   : > { %v374_v31 = vmul.f32 0.5, %v371_v29 }
 0x148   : > { %586 = vtanh.f32 %v374_v31 }
 0x152   : > { %v587_v32 = vpop.eup %586 }
 0x153   : > { %v376_v33 = vmul.f32 0.5, %v587_v32 }
 0x155   : > { %v377_v34 = vadd.f32 0.5, %v376_v33 }
 0x157   : > { %378 = vst [vmem:[%s221_s4] sm:$0x1] %v377_v34 }
 0x158   : > { %661 = shalt.err (!%p658_p1)
}
 0x159   : > { %s662_s11 = scalar_lea.hbm %s920_s30, 16  ;;  %s666_s8 = scalar_lea.hbm %s967_s3, 32 }
 0x15a   : > { %p663_p11 = scmp.ne.s32.totalorder %s920_s30, %s662_s11  ;;  %p667_p4 = scmp.lt.u32.totalorder %s920_s30, %s967_s3 }
 0x15b   : > { %p668_p10 = scmp.lt.u32.totalorder %s666_s8, %s662_s11  ;;  %p670_p6 = scmp.lt.u32.totalorder %s662_s11, %s920_s30 }
 0x15c   : > { %p664_p12 = pnand %p663_p11, %p980_p13 }
 0x15d   : > { %p669_p3 = por %p668_p10, %p667_p4 }
 0x15e   : > { %p665_p2 = pneg %p664_p12 }
 0x15f   : > { %p671_p7 = por %p670_p6, %p669_p3 }
 0x161   : > { %p672_p5 = pnand %p671_p7, %p665_p2 }
 0x163   : > { %675 = shalt.err (!%p672_p5)
}
 0x164   : > { %534 = dma.vmem_to_hbm [thread:$0]  (%p980_p13), %s922_s22, 16, %s920_s30, %s380_s26  }
 0x165 PF: > { %s404_s23 = sand.u32 1, %s706_s12   ;;  %p981_p8 = scmp.ne.s32.totalorder %s973_s25, 0 }
 0x166   : > { %p982_p9 = scmp.ge.s32.totalorder %s718_s15, 2  ;;  %s405_s9 = scalar_lea.sflag [#allocation4], %s404_s23 }
 0x168   : > { %p544_p0 = pnand %p982_p9, %p981_p8 }
 0x16a   : > { %701 = dma.done.wait (!%p544_p0), %s405_s9, 16  }
 0x16b   : > { %703 = vsyncadd (!%p544_p0), %s405_s9, 4294967280  ;;  %p19_p1 = scmp.ge.s32.totalorder %s773_s18, 4   ;;  %s983_s12 = smov %s710_s13 }
 0x16c   : > { %s984_s13 = smov %s714_s14  ;;  %s985_s14 = smov %s785_s21 }
 0x16d   : > { %s986_s15 = smov %s773_s18  ;;  %21 = sbr.rel (!%p19_p1) target bundleno = 7 (0x7), region = 90 }
 0x174   :  { %409 = vsyncpa [#allocation3], 1 }
 0x175   :  { %411 = vsyncpa [#allocation3 + $0x1], 1 }
 0x176   :  { %412 = vsyncpa [#allocation6], 1 }
 0x177   :  { %414 = vsyncpa [#allocation6 + $0x1], 1 }
 0x178   :  { %415 = vsyncpa [#allocation4], 1 }
 0x179   :  { %417 = vsyncpa [#allocation4 + $0x1], 1 }

</bundles_post_ra>
